<compile_context>
chip_gen: v5e
topology: v5e:2x2
jax: 0.10.0
libtpu: 0.0.40
codegen_flags: <defaults>
</compile_context>

<pallas_src>
import functools

import jax
import jax.numpy as jnp
from jax.experimental import pallas as pl
from jax.experimental.pallas import tpu as pltpu


_LANE = 128
_SUBLANE = 8
# Per-call VMEM budget for pipelined blocks.  Sized against v7x (64 MiB
# physical / ~32 MiB default scoped per TensorCore) so the same tiling is
# also safe on v5e / v6e (128 MiB physical).
_VMEM_BUDGET = 36 * (1 << 20)


def _round_up(a: int, m: int) -> int:
    return ((a + m - 1) // m) * m


def _pad_dims(D: int, F: int):
    """Lane-granule (128) padding only -- independent of tiling choices."""
    return _round_up(max(D, 1), _LANE), _round_up(max(F, 1), _LANE)


def _largest_block(total: int, cap: int) -> int:
    """Largest multiple of 128 dividing `total` (a 128 multiple) and <= cap."""
    m = total // _LANE
    best = 1
    for d in range(1, m + 1):
        if m % d == 0 and _LANE * d <= cap:
            best = d
    return _LANE * best


def pack_ql1_params(weights, biases, *, weight_dtype=jnp.bfloat16):
    """One-time packing of per-encoder Linear params.

    weights: list of (F_i, D) torch.nn.Linear-style weights.
    biases:  list of (F_i,) biases.
    Returns (w_pad, b_pad): (Dp, Fp) transposed/concatenated weight slab and
    (1, Fp) bias, zero-padded to lane (128) granularity only.
    """
    w_cat = jnp.concatenate(
        [jnp.asarray(w).T.astype(weight_dtype) for w in weights], axis=-1)
    b_cat = jnp.concatenate(
        [jnp.asarray(b) for b in biases], axis=-1).astype(jnp.float32)
    D = int(w_cat.shape[0])
    F = int(w_cat.shape[1])
    Dp, Fp = _pad_dims(D, F)
    w_pad = jnp.zeros((Dp, Fp), weight_dtype).at[:D, :F].set(w_cat)
    b_pad = jnp.zeros((1, Fp), jnp.float32).at[0, :F].set(b_cat)
    return w_pad, b_pad


def _ql1_fused_kernel(x_ref, w_ref, b_ref, o_ref, *, apply_relu: bool):
    # Single-K-block path: one MXU matmul per grid step; bias + ReLU fused.
    x = x_ref[...].astype(w_ref.dtype)
    y = jnp.dot(x, w_ref[...], preferred_element_type=jnp.float32) + b_ref[...]
    if apply_relu:
        y = jnp.maximum(y, 0.0)
    o_ref[...] = y.astype(o_ref.dtype)


def _ql1_tiled_kernel(x_ref, w_ref, b_ref, o_ref, acc_ref, *, apply_relu: bool):
    # Fallback (M, N, K) path with a resident f32 accumulator.
    k = pl.program_id(2)

    @pl.when(k == 0)
    def _():
        acc_ref[...] = jnp.zeros_like(acc_ref)

    x = x_ref[...].astype(w_ref.dtype)
    acc_ref[...] += jnp.dot(x, w_ref[...], preferred_element_type=jnp.float32)

    @pl.when(k == pl.num_programs(2) - 1)
    def _():
        y = acc_ref[...] + b_ref[...]
        if apply_relu:
            y = jnp.maximum(y, 0.0)
        o_ref[...] = y.astype(o_ref.dtype)


def ql1_head_forward(x, w_pad, b_pad, out_features_total, *, relu: bool):
    """QL1Head forward.

    x:       (..., C, H, W) input (PyTorch NCHW convention).
    w_pad:   (Dp, Fp) packed, lane-padded weight slab from pack_ql1_params.
    b_pad:   (1, Fp) packed, lane-padded bias.
    out_features_total: sum of per-encoder out_features (un-padded F).
    """
    lead = x.shape[:-3]
    D = int(x.shape[-3] * x.shape[-2] * x.shape[-1])
    F = int(out_features_total)
    Dp, Fp = int(w_pad.shape[0]), int(w_pad.shape[1])
    assert (Dp, Fp) == _pad_dims(D, F), "packed params do not match dims"

    B = 1
    for s in lead:
        B *= int(s)
    if B == 0:  # zero-batch edge case: nothing to compute
        return jnp.zeros(lead + (F,), jnp.float32)

    x_flat = x.reshape((B, D))
    xi = jnp.dtype(x_flat.dtype).itemsize
    wi = jnp.dtype(w_pad.dtype).itemsize

    # ---- batch (M) tiling --------------------------------------------------
    Bp8 = _round_up(B, _SUBLANE)
    tm = 256 if Bp8 > 256 else Bp8      # single M block for small B
    Bp = _round_up(B, tm)
    mb = Bp // tm

    # ---- N tiling: single N block, unless we split it for megacore ---------
    tn = Fp
    if mb == 1 and Fp >= 2 * _LANE and (Fp // _LANE) % 2 == 0:
        # Grid would otherwise be (1, 1): split the output-feature axis so a
        # second TensorCore (v7x) has a parallel block to work on.
        tn = Fp // 2
    nb = Fp // tn

    # ---- fused path feasibility: full reduction (K = Dp) in one block ------
    fused_bytes = (2 * (tm * Dp * xi + Dp * tn * wi + tn * 4)
                   + 2 * tm * tn * 4)
    use_fused = fused_bytes <= _VMEM_BUDGET

    # Pad the activation only when actually required (a few B tail rows
    # and/or a non-lane-aligned D); D = C*H*W is usually already 128-aligned.
    if Bp != B or Dp != D:
        x_flat = jnp.pad(x_flat, ((0, Bp - B), (0, Dp - D)))

    if use_fused:
        grid = (mb, nb)
        kernel = functools.partial(_ql1_fused_kernel, apply_relu=relu)
        in_specs = [
            pl.BlockSpec((tm, Dp), lambda i, j: (i, 0)),
            pl.BlockSpec((Dp, tn), lambda i, j: (0, j)),
            pl.BlockSpec((1, tn), lambda i, j: (0, j)),
        ]
        out_specs = pl.BlockSpec((tm, tn), lambda i, j: (i, j))
        scratch_shapes = []
        dim_sem = ("parallel", "parallel")
        # x and the weight slab are each streamed exactly once.
        bytes_accessed = Bp * Dp * xi + Dp * Fp * wi + Fp * 4 + Bp * Fp * 4
        vmem_need = fused_bytes
    else:
        tn = _largest_block(Fp, 512)
        nb = Fp // tn
        # Largest K block keeping double-buffered inputs + acc under budget.
        tk = _LANE
        for mult in range(Dp // _LANE, 0, -1):
            if (Dp // _LANE) % mult:
                continue
            cand = _LANE * mult
            need = (2 * (tm * cand * xi + cand * tn * wi + tn * 4)
                    + 2 * tm * tn * 4 + tm * tn * 4)
            if need <= _VMEM_BUDGET:
                tk = cand
                break
        kb = Dp // tk
        grid = (mb, nb, kb)
        kernel = functools.partial(_ql1_tiled_kernel, apply_relu=relu)
        in_specs = [
            pl.BlockSpec((tm, tk), lambda i, j, k: (i, k)),
            pl.BlockSpec((tk, tn), lambda i, j, k: (k, j)),
            pl.BlockSpec((1, tn), lambda i, j, k: (0, j)),
        ]
        out_specs = pl.BlockSpec((tm, tn), lambda i, j, k: (i, j))
        scratch_shapes = [pltpu.VMEM((tm, tn), jnp.float32)]
        dim_sem = ("parallel", "parallel", "arbitrary")
        # Account for cross-tile re-streaming (x per N tile, weights per M tile).
        bytes_accessed = (Bp * Dp * xi * nb + Dp * Fp * wi * mb
                          + Fp * 4 + Bp * Fp * 4)
        vmem_need = (2 * (tm * tk * xi + tk * tn * wi + tn * 4)
                     + 2 * tm * tn * 4 + tm * tn * 4)

    cost = pl.CostEstimate(
        flops=2 * Bp * Dp * Fp,
        transcendentals=0,
        bytes_accessed=int(bytes_accessed),
    )
    vmem_limit = int(min(max(vmem_need + vmem_need // 4 + (2 << 20), 32 << 20),
                         48 << 20))

    out_p = pl.pallas_call(
        kernel,
        out_shape=jax.ShapeDtypeStruct((Bp, Fp), jnp.float32),
        grid_spec=pltpu.PrefetchScalarGridSpec(
            num_scalar_prefetch=0,
            grid=grid,
            in_specs=in_specs,
            out_specs=out_specs,
            scratch_shapes=scratch_shapes,
        ),
        compiler_params=pltpu.CompilerParams(
            dimension_semantics=dim_sem,
            vmem_limit_bytes=vmem_limit),
        cost_estimate=cost,
    )(x_flat, w_pad, b_pad)

    # Strip padding and restore leading dims.
    out = out_p[:B, :F]
    return out.reshape(lead + (F,))


def _reference(x_nchw, weights, biases, relu):
    B = x_nchw.shape[0]
    x_flat = x_nchw.reshape(B, -1).astype(jnp.float32)
    reps = [x_flat @ w.T + b for w, b in zip(weights, biases)]
    rep = jnp.concatenate(reps, axis=-1)
    if relu:
        rep = jnp.maximum(rep, 0.0)
    return rep


if __name__ == "__main__":
    key = jax.random.PRNGKey(0)

    # Small shapes consistent with the forward: NCHW input, flattened to D.
    B, C, H, W = 2, 4, 16, 16
    D = C * H * W
    out_features = [32, 32]          # two encoders -> F_total = 64
    relu = True                      # head type contains 'relu'

    k_x, *k_params = jax.random.split(key, 1 + 2 * len(out_features))
    x = jax.random.normal(k_x, (B, C, H, W), dtype=jnp.float32)

    weights, biases = [], []
    for idx, f in enumerate(out_features):
        kw, kb = k_params[2 * idx], k_params[2 * idx + 1]
        bound = 1.0 / (D ** 0.5)     # torch.nn.Linear default init bounds
        weights.append(jax.random.uniform(kw, (f, D), jnp.float32, -bound, bound))
        biases.append(jax.random.uniform(kb, (f,), jnp.float32, -bound, bound))

    F_total = sum(out_features)
    y_ref = _reference(x, weights, biases, relu)

    fwd = jax.jit(functools.partial(
        ql1_head_forward, out_features_total=F_total, relu=relu))

    # bf16 weight slab (default): halved weight HBM traffic, f32 accumulation.
    w_bf16, b_bf16 = pack_ql1_params(weights, biases)           # bf16 default
    y_bf16 = jax.block_until_ready(fwd(x, w_bf16, b_bf16))
    assert y_bf16.shape == (B, F_total), y_bf16.shape
    assert jnp.allclose(y_bf16, y_ref, atol=2e-2, rtol=2e-2), (
        float(jnp.max(jnp.abs(y_bf16 - y_ref))))

    # f32 weight slab: tight numerical check of the kernel itself.
    w_f32, b_f32 = pack_ql1_params(weights, biases, weight_dtype=jnp.float32)
    y_f32 = jax.block_until_ready(fwd(x, w_f32, b_f32))
    assert y_f32.shape == (B, F_total), y_f32.shape
    assert jnp.allclose(y_f32, y_ref, atol=1e-4, rtol=1e-4), (
        float(jnp.max(jnp.abs(y_f32 - y_ref))))

    print("KERNEL_OK")
</pallas_src>

<mosaic_0001>
module attributes {stable_mosaic.version = 11 : i64} {
  func.func @_ql1_fused_kernel(%arg0: i32, %arg1: i32, %arg2: memref<8x1024xf32, #tpu.memory_space<vmem>>, %arg3: memref<1024x128xbf16, #tpu.memory_space<vmem>>, %arg4: memref<1x128xf32, #tpu.memory_space<vmem>>, %arg5: memref<8x128xf32, #tpu.memory_space<vmem>>) attributes {dimension_semantics = [#tpu.dimension_semantics<parallel>, #tpu.dimension_semantics<parallel>], iteration_bounds = array<i64: 1, 1>, scalar_prefetch = 0 : i64, scratch_operands = 0 : i64, tpu.core_type = #tpu.core_type<tc>, window_params = [{transform_indices = @transform_0, window_bounds = array<i64: 8, 1024>}, {transform_indices = @transform_1, window_bounds = array<i64: 1024, 128>}, {transform_indices = @transform_2, window_bounds = array<i64: 1, 128>}, {transform_indices = @transform_3, window_bounds = array<i64: 8, 128>}]} {
    %c0 = arith.constant 0 : index
    %c0_0 = arith.constant 0 : index
    %0 = vector.load %arg2[%c0, %c0_0] : memref<8x1024xf32, #tpu.memory_space<vmem>>, vector<8x1024xf32>
    %1 = arith.truncf %0 : vector<8x1024xf32> to vector<8x1024xbf16>
    %c0_1 = arith.constant 0 : index
    %c0_2 = arith.constant 0 : index
    %2 = vector.load %arg3[%c0_1, %c0_2] : memref<1024x128xbf16, #tpu.memory_space<vmem>>, vector<1024x128xbf16>
    %cst = arith.constant dense<0.000000e+00> : vector<8x128xf32>
    %3 = tpu.matmul %1, %2, %cst {dimension_numbers = #tpu.dot_dimension_numbers<[1], [0], [0], [1], [0, 0, 1, 1], [], []>} : vector<8x1024xbf16>, vector<1024x128xbf16>, vector<8x128xf32> -> vector<8x128xf32>
    %c0_3 = arith.constant 0 : index
    %c0_4 = arith.constant 0 : index
    %4 = vector.load %arg4[%c0_3, %c0_4] : memref<1x128xf32, #tpu.memory_space<vmem>>, vector<1x128xf32>
    %5 = vector.broadcast %4 : vector<1x128xf32> to vector<8x128xf32>
    %6 = arith.addf %3, %5 : vector<8x128xf32>
    %cst_5 = arith.constant 0.000000e+00 : f32
    %7 = vector.broadcast %cst_5 : f32 to vector<8x128xf32>
    %8 = arith.maximumf %6, %7 : vector<8x128xf32>
    %c0_6 = arith.constant 0 : index
    %c0_7 = arith.constant 0 : index
    %9 = vector.load %arg5[%c0_6, %c0_7] : memref<8x128xf32, #tpu.memory_space<vmem>>, vector<8x128xf32>
    tpu.vector_store %arg5[%c0_6, %c0_7], %8 {strides = array<i32>} : memref<8x128xf32, #tpu.memory_space<vmem>>, vector<8x128xf32>,
    return
  }
  func.func @transform_0(%arg0: i32, %arg1: i32) -> (i32, i32) {
    %c0_i32 = arith.constant 0 : i32
    %c0_i32_0 = arith.constant 0 : i32
    return %arg0, %c0_i32 : i32, i32
  }
  func.func @transform_1(%arg0: i32, %arg1: i32) -> (i32, i32) {
    %c0_i32 = arith.constant 0 : i32
    %c0_i32_0 = arith.constant 0 : i32
    return %c0_i32, %arg1 : i32, i32
  }
  func.func @transform_2(%arg0: i32, %arg1: i32) -> (i32, i32) {
    %c0_i32 = arith.constant 0 : i32
    %c0_i32_0 = arith.constant 0 : i32
    return %c0_i32, %arg1 : i32, i32
  }
  func.func @transform_3(%arg0: i32, %arg1: i32) -> (i32, i32) {
    %c0_i32 = arith.constant 0 : i32
    return %arg0, %arg1 : i32, i32
  }
}

</mosaic_0001>

<bundles_post_ra>
// kernel: ql1_head_forward.1
= control target key start
LH: loop header
LB: loop body
LE: loop exit
PB: predicated region body
PF: predicated region fallthrough
CT: control target
= control target key end

     0   :  { %8 = vsyncpa [#allocation3], 0  ;;  %s1023_s15 = smov [#allocation2]   ;;  %s1024_s17 = smov 64   ;;  %s1079_s0 = inlined_call_operand.vmem [shape: f32[8,1024], index: 0, kind: input, shape index: {}]   ;;  %s1080_s1 = inlined_call_operand.hbm [shape: bf16[1024,128], index: 1, kind: input, shape index: {}]   ;;  %s1081_s2 = inlined_call_operand.vmem [shape: f32[1,128], index: 2, kind: input, shape index: {}]   ;;  %s1082_s3 = inlined_call_operand.vmem [shape: f32[8,128], index: 3, kind: output, shape index: {}]  }
   0x1   :  { %s15_s14 = sshll.u32 %s1080_s1, 4  ;;  %s17_s16 = sshll.u32 %s1023_s15, 4  ;;  %s16_s14 = int_to_ptr.hbm [resolvable:$true] %s15_s14  ;;  %s18_s16 = int_to_ptr.vmem [resolvable:$true] %s17_s16 }
   0x2   :  { %s1025_s18 = smov 4  }
   0x3   :  { %23 = dma.hbm_to_vmem [thread:$0]  %s16_s14, 8192, %s18_s16, [#allocation3], %s1024_s17, %s1024_s17, %s1025_s18  }
   0x4   :  { %1021 = dma.done.wait [#allocation3], 8192  }
   0x5   :  { %1022 = vsyncadd [#allocation3], 4294959104  ;;  %v936_v0 = vld [vmem:[#allocation2 + $0x38] sm:$0xff]  ;;  %v935_v4 = vld [vmem:[#allocation2 + $0x30] sm:$0xff] }
   0x6   :  { %v944_v1 = vld [vmem:[#allocation2 + $0x78] sm:$0xff]  ;;  %562 = vmatpush.bf16.msra.mxu0 %v936_v0  ;;  %v943_v5 = vld [vmem:[#allocation2 + $0x70] sm:$0xff]  ;;  %v934_v8 = vld [vmem:[#allocation2 + $0x28] sm:$0xff] }
   0x7   :  { %v952_v2 = vld [vmem:[#allocation2 + $0xb8] sm:$0xff]  ;;  %575 = vmatpush.bf16.msra.mxu1 %v944_v1  ;;  %v951_v6 = vld [vmem:[#allocation2 + $0xb0] sm:$0xff]  ;;  %v942_v9 = vld [vmem:[#allocation2 + $0x68] sm:$0xff] }
   0x8   :  { %v960_v3 = vld [vmem:[#allocation2 + $0xf8] sm:$0xff]  ;;  %588 = vmatpush.bf16.msra.mxu2 %v952_v2  ;;  %v959_v7 = vld [vmem:[#allocation2 + $0xf0] sm:$0xff]  ;;  %v950_v10 = vld [vmem:[#allocation2 + $0xa8] sm:$0xff] }
   0x9   :  { %601 = vmatpush.bf16.msra.mxu3 %v960_v3  ;;  %v958_v11 = vld [vmem:[#allocation2 + $0xe8] sm:$0xff]  ;;  %v933_v12 = vld [vmem:[#allocation2 + $0x20] sm:$0xff]  ;;  %v932_v16 = vld [vmem:[#allocation2 + $0x18] sm:$0xff] }
   0xa   :  { %563 = vmatpush.bf16.msra.mxu0 %v935_v4  ;;  %v941_v13 = vld [vmem:[#allocation2 + $0x60] sm:$0xff]  ;;  %v940_v17 = vld [vmem:[#allocation2 + $0x58] sm:$0xff]  ;;  %v931_v20 = vld [vmem:[#allocation2 + $0x10] sm:$0xff] }
   0xb   :  { %576 = vmatpush.bf16.msra.mxu1 %v943_v5  ;;  %v949_v14 = vld [vmem:[#allocation2 + $0xa0] sm:$0xff]  ;;  %v948_v18 = vld [vmem:[#allocation2 + $0x98] sm:$0xff]  ;;  %v939_v21 = vld [vmem:[#allocation2 + $0x50] sm:$0xff] }
   0xc   :  { %589 = vmatpush.bf16.msra.mxu2 %v951_v6  ;;  %v957_v15 = vld [vmem:[#allocation2 + $0xe0] sm:$0xff]  ;;  %v956_v19 = vld [vmem:[#allocation2 + $0xd8] sm:$0xff]  ;;  %v947_v22 = vld [vmem:[#allocation2 + $0x90] sm:$0xff] }
   0xd   :  { %602 = vmatpush.bf16.msra.mxu3 %v959_v7  ;;  %v955_v23 = vld [vmem:[#allocation2 + $0xd0] sm:$0xff]  ;;  %v930_v24 = vld [vmem:[#allocation2 + $0x8] sm:$0xff]  ;;  %v929_v28 = vld [vmem:[#allocation2] sm:$0xff] }
   0xe   :  { %564 = vmatpush.bf16.msra.mxu0 %v934_v8  ;;  %v938_v25 = vld [vmem:[#allocation2 + $0x48] sm:$0xff]  ;;  %v937_v29 = vld [vmem:[#allocation2 + $0x40] sm:$0xff]  ;;  %v968_v32 = vld [vmem:[#allocation2 + $0x138] sm:$0xff] }
   0xf   :  { %577 = vmatpush.bf16.msra.mxu1 %v942_v9  ;;  %v946_v26 = vld [vmem:[#allocation2 + $0x88] sm:$0xff]  ;;  %v945_v30 = vld [vmem:[#allocation2 + $0x80] sm:$0xff]  ;;  %v32_v33 = vld [vmem:[%s1079_s0 + $0x10] sm:$0xff] }
  0x10   :  { %590 = vmatpush.bf16.msra.mxu2 %v950_v10  ;;  %v954_v27 = vld [vmem:[#allocation2 + $0xc8] sm:$0xff]  ;;  %v953_v31 = vld [vmem:[#allocation2 + $0xc0] sm:$0xff]  ;;  %v33_v34 = vld [vmem:[%s1079_s0 + $0x18] sm:$0xff]  ;;  %v40_v40 = vpack.c.bf16 %v32_v33, %v32_v33 }
  0x11   :  { %603 = vmatpush.bf16.msra.mxu3 %v958_v11  ;;  %v976_v35 = vld [vmem:[#allocation2 + $0x178] sm:$0xff]  ;;  %v30_v36 = vld [vmem:[%s1079_s0] sm:$0xff]  ;;  %v31_v37 = vld [vmem:[%s1079_s0 + $0x8] sm:$0xff]  ;;  %v41_v41 = vpack.c.bf16 %v33_v34, %v33_v34 }
  0x12   :  { %565 = vmatpush.bf16.msra.mxu0 %v933_v12  ;;  %v984_v38 = vld [vmem:[#allocation2 + $0x1b8] sm:$0xff]  ;;  %v38_v42 = vpack.c.bf16 %v30_v36, %v30_v36  ;;  %v39_v43 = vpack.c.bf16 %v31_v37, %v31_v37  ;;  %v967_v44 = vld [vmem:[#allocation2 + $0x130] sm:$0xff]  ;;  %v966_v48 = vld [vmem:[#allocation2 + $0x128] sm:$0xff] }
  0x13   :  { %578 = vmatpush.bf16.msra.mxu1 %v941_v13  ;;  %v992_v39 = vld [vmem:[#allocation2 + $0x1f8] sm:$0xff]  ;;  %v975_v45 = vld [vmem:[#allocation2 + $0x170] sm:$0xff]  ;;  %v974_v49 = vld [vmem:[#allocation2 + $0x168] sm:$0xff] }
  0x14   :  { %591 = vmatpush.bf16.msra.mxu2 %v949_v14  ;;  %v983_v46 = vld [vmem:[#allocation2 + $0x1b0] sm:$0xff]  ;;  %v982_v50 = vld [vmem:[#allocation2 + $0x1a8] sm:$0xff]  ;;  %v965_v52 = vld [vmem:[#allocation2 + $0x120] sm:$0xff] }
  0x15   :  { %604 = vmatpush.bf16.msra.mxu3 %v957_v15  ;;  %v991_v47 = vld [vmem:[#allocation2 + $0x1f0] sm:$0xff]  ;;  %v990_v51 = vld [vmem:[#allocation2 + $0x1e8] sm:$0xff]  ;;  %v973_v53 = vld [vmem:[#allocation2 + $0x160] sm:$0xff] }
  0x16   :  { %566 = vmatpush.bf16.msra.mxu0 %v932_v16  ;;  %v981_v54 = vld [vmem:[#allocation2 + $0x1a0] sm:$0xff]  ;;  %v964_v56 = vld [vmem:[#allocation2 + $0x118] sm:$0xff]  ;;  %v963_v60 = vld [vmem:[#allocation2 + $0x110] sm:$0xff] }
  0x17   :  { %579 = vmatpush.bf16.msra.mxu1 %v940_v17  ;;  %v989_v55 = vld [vmem:[#allocation2 + $0x1e0] sm:$0xff]  ;;  %v972_v57 = vld [vmem:[#allocation2 + $0x158] sm:$0xff]  ;;  %v971_v61 = vld [vmem:[#allocation2 + $0x150] sm:$0xff] }
  0x18   :  { %592 = vmatpush.bf16.msra.mxu2 %v948_v18  ;;  %v980_v58 = vld [vmem:[#allocation2 + $0x198] sm:$0xff]  ;;  %v979_v62 = vld [vmem:[#allocation2 + $0x190] sm:$0xff]  ;;  %v962_v0 = vld [vmem:[#allocation2 + $0x108] sm:$0xff] }
  0x19   :  { %605 = vmatpush.bf16.msra.mxu3 %v956_v19  ;;  %v988_v59 = vld [vmem:[#allocation2 + $0x1d8] sm:$0xff]  ;;  %v987_v63 = vld [vmem:[#allocation2 + $0x1d0] sm:$0xff]  ;;  %v970_v1 = vld [vmem:[#allocation2 + $0x148] sm:$0xff] }
  0x1a   :  { %567 = vmatpush.bf16.msra.mxu0 %v931_v20  ;;  %v978_v2 = vld [vmem:[#allocation2 + $0x188] sm:$0xff]  ;;  %v961_v4 = vld [vmem:[#allocation2 + $0x100] sm:$0xff]  ;;  %v36_v10 = vld [vmem:[%s1079_s0 + $0x30] sm:$0xff] }
  0x1b   :  { %580 = vmatpush.bf16.msra.mxu1 %v939_v21  ;;  %v986_v3 = vld [vmem:[#allocation2 + $0x1c8] sm:$0xff]  ;;  %v969_v5 = vld [vmem:[#allocation2 + $0x140] sm:$0xff]  ;;  %v37_v11 = vld [vmem:[%s1079_s0 + $0x38] sm:$0xff]  ;;  %v44_v14 = vpack.c.bf16 %v36_v10, %v36_v10 }
  0x1c   :  { %593 = vmatpush.bf16.msra.mxu2 %v947_v22  ;;  %v977_v6 = vld [vmem:[#allocation2 + $0x180] sm:$0xff]  ;;  %v35_v8 = vld [vmem:[%s1079_s0 + $0x28] sm:$0xff]  ;;  %v45_v15 = vpack.c.bf16 %v37_v11, %v37_v11 }
  0x1d   :  { %606 = vmatpush.bf16.msra.mxu3 %v955_v23  ;;  %v34_v7 = vld [vmem:[%s1079_s0 + $0x20] sm:$0xff]  ;;  %v43_v13 = vpack.c.bf16 %v35_v8, %v35_v8 }
  0x1e   :  { %568 = vmatpush.bf16.msra.mxu0 %v930_v24  ;;  %v985_v9 = vld [vmem:[#allocation2 + $0x1c0] sm:$0xff]  ;;  %v42_v12 = vpack.c.bf16 %v34_v7, %v34_v7 }
  0x1f   :  { %581 = vmatpush.bf16.msra.mxu1 %v938_v25  ;;  %v996_v22 = vld [vmem:[%s1081_s2] ss:$0 sm:$0xff] }
  0x20   :  { %594 = vmatpush.bf16.msra.mxu2 %v946_v26 }
  0x21   :  { %607 = vmatpush.bf16.msra.mxu3 %v954_v27 }
  0x22   :  { %569 = vmatpush.bf16.msra.mxu0 %v929_v28 }
  0x23   :  { %582 = vmatpush.bf16.msra.mxu1 %v937_v29 }
  0x24   :  { %595 = vmatpush.bf16.msra.mxu2 %v945_v30 }
  0x25   :  { %608 = vmatpush.bf16.msra.mxu3 %v953_v31  ;;  %570 = vmatmul.bf16.vlgmr.msra.gmra.mxu0 %v38_v42 }
  0x26   :  { %614 = vmatpush.bf16.msrb.mxu0 %v968_v32  ;;  %583 = vmatmul.bf16.vlgmr.msra.gmra.mxu1 %v39_v43 }
  0x27   :  { %627 = vmatpush.bf16.msrb.mxu1 %v976_v35  ;;  %596 = vmatmul.bf16.vlgmr.msra.gmra.mxu2 %v40_v40 }
  0x28   :  { %640 = vmatpush.bf16.msrb.mxu2 %v984_v38  ;;  %609 = vmatmul.bf16.vlgmr.msra.gmra.mxu3 %v41_v41 }
  0x29   :  { %653 = vmatpush.bf16.msrb.mxu3 %v992_v39 }
  0x2a   :  { %615 = vmatpush.bf16.msrb.mxu0 %v967_v44 }
  0x2b   :  { %628 = vmatpush.bf16.msrb.mxu1 %v975_v45 }
  0x2c   :  { %641 = vmatpush.bf16.msrb.mxu2 %v983_v46 }
  0x2d   :  { %654 = vmatpush.bf16.msrb.mxu3 %v991_v47 }
  0x2e   :  { %616 = vmatpush.bf16.msrb.mxu0 %v966_v48 }
  0x2f   :  { %629 = vmatpush.bf16.msrb.mxu1 %v974_v49 }
  0x30   :  { %642 = vmatpush.bf16.msrb.mxu2 %v982_v50 }
  0x31   :  { %655 = vmatpush.bf16.msrb.mxu3 %v990_v51 }
  0x32   :  { %617 = vmatpush.bf16.msrb.mxu0 %v965_v52 }
  0x33   :  { %630 = vmatpush.bf16.msrb.mxu1 %v973_v53 }
  0x34   :  { %643 = vmatpush.bf16.msrb.mxu2 %v981_v54 }
  0x35   :  { %656 = vmatpush.bf16.msrb.mxu3 %v989_v55 }
  0x36   :  { %618 = vmatpush.bf16.msrb.mxu0 %v964_v56 }
  0x37   :  { %631 = vmatpush.bf16.msrb.mxu1 %v972_v57 }
  0x38   :  { %644 = vmatpush.bf16.msrb.mxu2 %v980_v58 }
  0x39   :  { %657 = vmatpush.bf16.msrb.mxu3 %v988_v59 }
  0x3a   :  { %619 = vmatpush.bf16.msrb.mxu0 %v963_v60 }
  0x3b   :  { %632 = vmatpush.bf16.msrb.mxu1 %v971_v61 }
  0x3c   :  { %645 = vmatpush.bf16.msrb.mxu2 %v979_v62 }
  0x3d   :  { %658 = vmatpush.bf16.msrb.mxu3 %v987_v63 }
  0x3e   :  { %620 = vmatpush.bf16.msrb.mxu0 %v962_v0 }
  0x3f   :  { %633 = vmatpush.bf16.msrb.mxu1 %v970_v1 }
  0x40   :  { %646 = vmatpush.bf16.msrb.mxu2 %v978_v2 }
  0x41   :  { %659 = vmatpush.bf16.msrb.mxu3 %v986_v3 }
  0x42   :  { %621 = vmatpush.bf16.msrb.mxu0 %v961_v4 }
  0x43   :  { %634 = vmatpush.bf16.msrb.mxu1 %v969_v5 }
  0x44   :  { %647 = vmatpush.bf16.msrb.mxu2 %v977_v6 }
  0x45   :  { %660 = vmatpush.bf16.msrb.mxu3 %v985_v9  ;;  %622 = vmatmul.bf16.vlgmr.msrb.gmra.mxu0 %v42_v12 }
  0x46   :  { %635 = vmatmul.bf16.vlgmr.msrb.gmra.mxu1 %v43_v13 }
  0x47   :  { %648 = vmatmul.bf16.vlgmr.msrb.gmra.mxu2 %v44_v14 }
  0x48   :  { %661 = vmatmul.bf16.vlgmr.msrb.gmra.mxu3 %v45_v15 }
  0xa2   :  { %v571_v16 = vpop.f32.mrf.mxu0 }
  0xa3   :  { %v584_v17 = vpop.f32.mrf.mxu1  ;;  %v572_v25 = vadd.f32 %v996_v22, %v571_v16 }
  0xa5   :  { %v585_v26 = vadd.f32 %v584_v17, %v572_v25 }
  0xaa   :  { %v597_v18 = vpop.f32.mrf.mxu2  ;;  %v573_v20 = vpop.f32.mrf.mxu0 }
  0xab   :  { %v610_v19 = vpop.f32.mrf.mxu3  ;;  %v586_v21 = vpop.f32.mrf.mxu1  ;;  %v598_v27 = vadd.f32 %v597_v18, %v585_v26 }
  0xad   :  { %v611_v28 = vadd.f32 %v610_v19, %v598_v27 }
  0xb2   :  { %v599_v23 = vpop.f32.mrf.mxu2 }
  0xb3   :  { %v612_v24 = vpop.f32.mrf.mxu3 }
  0xc2   :  { %v623_v29 = vpop.f32.mrf.mxu0 }
  0xc3   :  { %v636_v30 = vpop.f32.mrf.mxu1  ;;  %v624_v31 = vadd.f32 %v623_v29, %v611_v28 }
  0xc5   :  { %v637_v32 = vadd.f32 %v636_v30, %v624_v31 }
  0xca   :  { %v649_v33 = vpop.f32.mrf.mxu2  ;;  %v625_v36 = vpop.f32.mrf.mxu0 }
  0xcb   :  { %v662_v34 = vpop.f32.mrf.mxu3  ;;  %v650_v35 = vadd.f32 %v649_v33, %v637_v32  ;;  %v638_v37 = vpop.f32.mrf.mxu1 }
  0xcd   :  { %v663_v38 = vadd.f32 %v662_v34, %v650_v35 }
  0xcf   :  { %v666_v39 = vmax.f32 %v663_v38, 0.0 }
  0xd1   :  { %667 = vst [vmem:[%s1082_s3] sm:$0xff] %v666_v39 }
  0xd2   :  { %v651_v40 = vpop.f32.mrf.mxu2 }
  0xd3   :  { %v664_v41 = vpop.f32.mrf.mxu3 }
  0xd4   :  { %672 = vsyncpa [#allocation3], 1 }

</bundles_post_ra>
